<compile_context>
chip_gen: v7x
topology: tpu7x:2x2x1
jax: 0.10.0
libtpu: 0.0.40
codegen_flags: <defaults>
</compile_context>

<pallas_src>
import jax
import jax.numpy as jnp
from jax.experimental import pallas as pl
from jax.experimental.pallas import tpu as pltpu


def _round_up(x: int, m: int) -> int:
    return ((x + m - 1) // m) * m


def _mlp_kernel(x_ref, w1_ref, b1_ref, w2_ref, b2_ref, o_ref):
    # ReLU
    h = jnp.maximum(x_ref[...], 0.0)

    # Linear 1: (TB, D) @ (D, D) + (1, D)  -- MXU matmul, f32 accumulation
    h = jnp.dot(h, w1_ref[...], preferred_element_type=jnp.float32) + b1_ref[...]

    # TODO(synk): training-mode Dropout(p=0.5) omitted; eval-mode identity used.

    # Exact (erf-based) GELU, matching nn.GELU() default numerics.
    g = 0.5 * h * (1.0 + jax.lax.erf(h * jnp.float32(0.7071067811865476)))

    # Linear 2: (TB, D) @ (D, C_pad) + (1, C_pad)  -- lane-dense (C_pad % 128 == 0)
    out = jnp.dot(g, w2_ref[...], preferred_element_type=jnp.float32) + b2_ref[...]
    o_ref[...] = out.astype(o_ref.dtype)


def simple_forward(x, w1, b1, w2, b2, *, block_b: int = 512):
    """Fused forward pass of the `Simple` MLP.

    x : (B, D) activations
    w1: (D, D), b1: (D,)   -- first Linear, stored (in_features, out_features)
    w2: (D, C), b2: (C,)   -- second Linear
    Returns (B, C).
    """
    B, D = x.shape
    C = w2.shape[1]

    # Lane-dense padded output width (multiple of 128 -> unmasked vst).
    C_pad = _round_up(max(C, 128), 128)

    # Batch tile: multiple of 8 sublanes, capped at block_b; pad B to a multiple.
    TB = min(block_b, _round_up(B, 8))
    B_pad = _round_up(B, TB)

    x_p = x if B_pad == B else jnp.pad(x, ((0, B_pad - B), (0, 0)))
    b1_2d = b1.reshape(1, D)
    w2_p = jnp.pad(w2, ((0, 0), (0, C_pad - C)))
    b2_2d = jnp.pad(b2.reshape(1, C), ((0, 0), (0, C_pad - C)))

    out_p = pl.pallas_call(
        _mlp_kernel,
        out_shape=jax.ShapeDtypeStruct((B_pad, C_pad), x.dtype),
        grid_spec=pl.GridSpec(
            grid=(B_pad // TB,),
            in_specs=[
                pl.BlockSpec((TB, D), lambda i: (i, 0)),       # x tile
                pl.BlockSpec((D, D), lambda i: (0, 0)),        # w1 (VMEM-resident)
                pl.BlockSpec((1, D), lambda i: (0, 0)),        # b1
                pl.BlockSpec((D, C_pad), lambda i: (0, 0)),    # w2 (padded lanes)
                pl.BlockSpec((1, C_pad), lambda i: (0, 0)),    # b2
            ],
            out_specs=pl.BlockSpec((TB, C_pad), lambda i: (i, 0)),
        ),
        compiler_params=pltpu.CompilerParams(
            dimension_semantics=("parallel",),  # shard batch tiles across TCs (v7x)
        ),
    )(x_p, w1, b1_2d, w2_p, b2_2d)

    return out_p[:B, :C]


if __name__ == "__main__":
    # Small shapes consistent with the module's forward:
    #   x: (batch, INP_SIZE), output: (batch, N_CLASSES)
    B, INP_SIZE, N_CLASSES = 8, 32, 4

    key = jax.random.PRNGKey(0)
    kx, kw1, kb1, kw2, kb2 = jax.random.split(key, 5)

    x = jax.random.normal(kx, (B, INP_SIZE), dtype=jnp.float32)

    # Deterministic parameter init (uniform, PyTorch-Linear-like scale).
    lim1 = 1.0 / jnp.sqrt(jnp.float32(INP_SIZE))
    w1 = jax.random.uniform(kw1, (INP_SIZE, INP_SIZE), jnp.float32, -lim1, lim1)
    b1 = jax.random.uniform(kb1, (INP_SIZE,), jnp.float32, -lim1, lim1)
    w2 = jax.random.uniform(kw2, (INP_SIZE, N_CLASSES), jnp.float32, -lim1, lim1)
    b2 = jax.random.uniform(kb2, (N_CLASSES,), jnp.float32, -lim1, lim1)

    out = simple_forward(x, w1, b1, w2, b2)
    jax.block_until_ready(out)

    # Reference check in plain JAX (exact GELU, eval-mode dropout).
    h = jnp.maximum(x, 0.0) @ w1 + b1
    g = 0.5 * h * (1.0 + jax.lax.erf(h / jnp.sqrt(2.0)))
    ref = g @ w2 + b2
    assert out.shape == (B, N_CLASSES)
    assert jnp.allclose(out, ref, atol=1e-5, rtol=1e-5)

    print("KERNEL_OK")
</pallas_src>

<mosaic_0001>
module attributes {stable_mosaic.version = 11 : i64} {
  func.func @_mlp_kernel(%arg0: i32, %arg1: memref<8x32xf32, #tpu.memory_space<vmem>>, %arg2: memref<32x32xf32, #tpu.memory_space<vmem>>, %arg3: memref<1x32xf32, #tpu.memory_space<vmem>>, %arg4: memref<32x128xf32, #tpu.memory_space<vmem>>, %arg5: memref<1x128xf32, #tpu.memory_space<vmem>>, %arg6: memref<8x128xf32, #tpu.memory_space<vmem>>) attributes {dimension_semantics = [#tpu.dimension_semantics<parallel>], iteration_bounds = array<i64: 1>, scalar_prefetch = 0 : i64, scratch_operands = 0 : i64, tpu.core_type = #tpu.core_type<tc>, window_params = [{transform_indices = @transform_0, window_bounds = array<i64: 8, 32>}, {pipeline_mode = #tpu.pipeline_mode<synchronous>, transform_indices = @transform_1, window_bounds = array<i64: 32, 32>}, {pipeline_mode = #tpu.pipeline_mode<synchronous>, transform_indices = @transform_2, window_bounds = array<i64: 1, 32>}, {pipeline_mode = #tpu.pipeline_mode<synchronous>, transform_indices = @transform_3, window_bounds = array<i64: 32, 128>}, {pipeline_mode = #tpu.pipeline_mode<synchronous>, transform_indices = @transform_4, window_bounds = array<i64: 1, 128>}, {transform_indices = @transform_5, window_bounds = array<i64: 8, 128>}]} {
    %c0 = arith.constant 0 : index
    %c0_0 = arith.constant 0 : index
    %0 = vector.load %arg1[%c0, %c0_0] : memref<8x32xf32, #tpu.memory_space<vmem>>, vector<8x32xf32>
    %cst = arith.constant 0.000000e+00 : f32
    %1 = vector.broadcast %cst : f32 to vector<8x32xf32>
    %2 = arith.maximumf %0, %1 : vector<8x32xf32>
    %c0_1 = arith.constant 0 : index
    %c0_2 = arith.constant 0 : index
    %3 = vector.load %arg2[%c0_1, %c0_2] : memref<32x32xf32, #tpu.memory_space<vmem>>, vector<32x32xf32>
    %cst_3 = arith.constant dense<0.000000e+00> : vector<8x32xf32>
    %4 = tpu.matmul %2, %3, %cst_3 {dimension_numbers = #tpu.dot_dimension_numbers<[1], [0], [0], [1], [0, 0, 1, 1], [], []>} : vector<8x32xf32>, vector<32x32xf32>, vector<8x32xf32> -> vector<8x32xf32>
    %c0_4 = arith.constant 0 : index
    %c0_5 = arith.constant 0 : index
    %5 = vector.load %arg3[%c0_4, %c0_5] : memref<1x32xf32, #tpu.memory_space<vmem>>, vector<1x32xf32>
    %6 = vector.broadcast %5 : vector<1x32xf32> to vector<8x32xf32>
    %7 = arith.addf %4, %6 : vector<8x32xf32>
    %cst_6 = arith.constant 5.000000e-01 : f32
    %8 = vector.broadcast %cst_6 : f32 to vector<8x32xf32>
    %9 = arith.mulf %8, %7 : vector<8x32xf32>
    %cst_7 = arith.constant 0.707106769 : f32
    %10 = vector.broadcast %cst_7 : f32 to vector<8x32xf32>
    %11 = arith.mulf %7, %10 : vector<8x32xf32>
    %12 = math.erf %11 : vector<8x32xf32>
    %cst_8 = arith.constant 1.000000e+00 : f32
    %13 = vector.broadcast %cst_8 : f32 to vector<8x32xf32>
    %14 = arith.addf %13, %12 : vector<8x32xf32>
    %15 = arith.mulf %9, %14 : vector<8x32xf32>
    %c0_9 = arith.constant 0 : index
    %c0_10 = arith.constant 0 : index
    %16 = vector.load %arg4[%c0_9, %c0_10] : memref<32x128xf32, #tpu.memory_space<vmem>>, vector<32x128xf32>
    %cst_11 = arith.constant dense<0.000000e+00> : vector<8x128xf32>
    %17 = tpu.matmul %15, %16, %cst_11 {dimension_numbers = #tpu.dot_dimension_numbers<[1], [0], [0], [1], [0, 0, 1, 1], [], []>} : vector<8x32xf32>, vector<32x128xf32>, vector<8x128xf32> -> vector<8x128xf32>
    %c0_12 = arith.constant 0 : index
    %c0_13 = arith.constant 0 : index
    %18 = vector.load %arg5[%c0_12, %c0_13] : memref<1x128xf32, #tpu.memory_space<vmem>>, vector<1x128xf32>
    %19 = vector.broadcast %18 : vector<1x128xf32> to vector<8x128xf32>
    %20 = arith.addf %17, %19 : vector<8x128xf32>
    %c0_14 = arith.constant 0 : index
    %c0_15 = arith.constant 0 : index
    %21 = vector.load %arg6[%c0_14, %c0_15] : memref<8x128xf32, #tpu.memory_space<vmem>>, vector<8x128xf32>
    tpu.vector_store %arg6[%c0_14, %c0_15], %20 {strides = array<i32>} : memref<8x128xf32, #tpu.memory_space<vmem>>, vector<8x128xf32>,
    return
  }
  func.func @transform_0(%arg0: i32) -> (i32, i32) {
    %c0_i32 = arith.constant 0 : i32
    %c0_i32_0 = arith.constant 0 : i32
    return %arg0, %c0_i32 : i32, i32
  }
  func.func @transform_1(%arg0: i32) -> (i32, i32) {
    %c0_i32 = arith.constant 0 : i32
    %c0_i32_0 = arith.constant 0 : i32
    %c0_i32_1 = arith.constant 0 : i32
    return %c0_i32, %c0_i32_0 : i32, i32
  }
  func.func @transform_2(%arg0: i32) -> (i32, i32) {
    %c0_i32 = arith.constant 0 : i32
    %c0_i32_0 = arith.constant 0 : i32
    %c0_i32_1 = arith.constant 0 : i32
    return %c0_i32, %c0_i32_0 : i32, i32
  }
  func.func @transform_3(%arg0: i32) -> (i32, i32) {
    %c0_i32 = arith.constant 0 : i32
    %c0_i32_0 = arith.constant 0 : i32
    %c0_i32_1 = arith.constant 0 : i32
    return %c0_i32, %c0_i32_0 : i32, i32
  }
  func.func @transform_4(%arg0: i32) -> (i32, i32) {
    %c0_i32 = arith.constant 0 : i32
    %c0_i32_0 = arith.constant 0 : i32
    %c0_i32_1 = arith.constant 0 : i32
    return %c0_i32, %c0_i32_0 : i32, i32
  }
  func.func @transform_5(%arg0: i32) -> (i32, i32) {
    %c0_i32 = arith.constant 0 : i32
    %c0_i32_0 = arith.constant 0 : i32
    return %arg0, %c0_i32 : i32, i32
  }
}

</mosaic_0001>

<bundles_post_ra>
// kernel: tpu_custom_call.1
= control target key start
LH: loop header
LB: loop body
LE: loop exit
PB: predicated region body
PF: predicated region fallthrough
CT: control target
= control target key end

     0   :  { %10 = vsyncpa [#allocation3], 0  ;;  %s507_s0 = inlined_call_operand.hbm [shape: f32[8,32], index: 0, kind: input, shape index: {}]   ;;  %s508_s1 = inlined_call_operand.hbm [shape: f32[32,32], index: 1, kind: input, shape index: {}]   ;;  %s509_s2 = inlined_call_operand.vmem [shape: f32[1,32], index: 2, kind: input, shape index: {}]   ;;  %s510_s3 = inlined_call_operand.hbm [shape: f32[32,128], index: 3, kind: input, shape index: {}]   ;;  %s511_s4 = inlined_call_operand.vmem [shape: f32[1,128], index: 4, kind: input, shape index: {}]   ;;  %s512_s5 = inlined_call_operand.hbm [shape: f32[8,128], index: 5, kind: output, shape index: {}]  }
   0x1   :  { %11 = vsyncpa [#allocation6], 0 }
   0x2   :  { %12 = vsyncpa [#allocation4], 0  ;;  %s406_s18 = smov [#allocation5]   ;;  %s312_s22 = scalar_lea.hbm %s508_s1, 512 }
   0x3   :  { %s28_s19 = sshll.u32 %s406_s18, 4  ;;  %p313_p0 = scmp.ne.s32.totalorder %s508_s1, %s312_s22  ;;  %s29_s19 = int_to_ptr.vmem [resolvable:$true] %s28_s19 }
   0x4   :  { %p316_p1 = scmp.lt.u32.totalorder %s312_s22, %s508_s1 }
   0x6   :  { %p318_p2 = pnand %p316_p1, %p313_p0 }
   0x8   :  { %321 = shalt.err (!%p318_p2)
}
   0x9   :  { %s322_s27 = scalar_lea.vmem %s29_s19, 512  ;;  %p327_p4 = scmp.lt.s32.totalorder %s29_s19, %s29_s19 }
   0xa   :  { %p323_p3 = scmp.ne.s32.totalorder %s29_s19, %s322_s27  ;;  %p328_p5 = scmp.lt.s32.totalorder %s322_s27, %s322_s27 }
   0xc   :  { %p329_p6 = por %p328_p5, %p327_p4 }
   0xe   :  { %p330_p7 = pnand %p329_p6, %p323_p3 }
  0x10   :  { %333 = shalt.err (!%p330_p7)
}
  0x11   :  { %s407_s28 = smov 128   ;;  %s408_s29 = smov 8  }
  0x12   :  { %34 = dma.hbm_to_vmem [thread:$0]  %s508_s1, 512, %s29_s19, [#allocation6], %s407_s28, %s407_s28, %s408_s29  }
  0x13   :  { %s409_s7 = smov [#allocation2]   ;;  %s410_s9 = smov [#allocation7]  }
  0x14   :  { %s19_s8 = sshll.u32 %s409_s7, 4  ;;  %s42_s10 = sshll.u32 %s410_s9, 4  ;;  %s20_s8 = int_to_ptr.vmem [resolvable:$true] %s19_s8  ;;  %s43_s10 = int_to_ptr.vmem [resolvable:$true] %s42_s10 }
  0x15   :  { %s334_s13 = scalar_lea.hbm %s507_s0, 128 }
  0x16   :  { %p335_p8 = scmp.ne.s32.totalorder %s507_s0, %s334_s13  ;;  %p338_p9 = scmp.lt.u32.totalorder %s334_s13, %s507_s0 }
  0x18   :  { %p340_p10 = pnand %p338_p9, %p335_p8 }
  0x1a   :  { %343 = shalt.err (!%p340_p10)
}
  0x1b   :  { %s344_s1 = scalar_lea.vmem %s20_s8, 128  ;;  %p349_p12 = scmp.lt.s32.totalorder %s20_s8, %s20_s8 }
  0x1c   :  { %p345_p11 = scmp.ne.s32.totalorder %s20_s8, %s344_s1  ;;  %p350_p13 = scmp.lt.s32.totalorder %s344_s1, %s344_s1 }
  0x1e   :  { %p351_p0 = por %p350_p13, %p349_p12 }
  0x20   :  { %p352_p1 = pnand %p351_p0, %p345_p11 }
  0x22   :  { %355 = shalt.err (!%p352_p1)
}
  0x23   :  { %22 = dma.hbm_to_vmem [thread:$0]  %s507_s0, 128, %s20_s8, [#allocation3]  }
  0x24   :  { %s356_s22 = scalar_lea.hbm %s510_s3, 512 }
  0x25   :  { %p357_p2 = scmp.ne.s32.totalorder %s510_s3, %s356_s22  ;;  %p360_p3 = scmp.lt.u32.totalorder %s356_s22, %s510_s3 }
  0x27   :  { %p362_p4 = pnand %p360_p3, %p357_p2 }
  0x29   :  { %365 = shalt.err (!%p362_p4)
}
  0x2a   :  { %s366_s27 = scalar_lea.vmem %s43_s10, 512  ;;  %p371_p6 = scmp.lt.s32.totalorder %s43_s10, %s43_s10 }
  0x2b   :  { %p367_p5 = scmp.ne.s32.totalorder %s43_s10, %s366_s27  ;;  %p372_p7 = scmp.lt.s32.totalorder %s366_s27, %s366_s27 }
  0x2d   :  { %p373_p8 = por %p372_p7, %p371_p6 }
  0x2f   :  { %p374_p9 = pnand %p373_p8, %p367_p5 }
  0x31   :  { %377 = shalt.err (!%p374_p9)
}
  0x32   :  { %48 = dma.hbm_to_vmem [thread:$0]  %s510_s3, 512, %s43_s10, [#allocation6], %s407_s28, %s407_s28, %s408_s29  }
  0x33   :  { %400 = dma.done.wait [#allocation3], 128  }
  0x34   :  { %401 = vsyncadd [#allocation3], 4294967168 }
  0x35   :  { %402 = dma.done.wait [#allocation6], 1024  }
  0x36   :  { %403 = vsyncadd [#allocation6], 4294966272  ;;  %v411_v0 = vmov 0.0|0.0   ;;  %vm412_vm0 = vmmov 0   ;;  %v413_v1 = vmov 0.0   ;;  %v62_v2 = vld [vmem:[#allocation5] sm:$0xff] }
  0x37   :  { %289 = vmatprep.subr.bf16.mxu0 %v411_v0  ;;  %275 = vmatprep.mubr.msk.f32.mxu0 %vm412_vm0, %v413_v1  ;;  %v63_v3 = vld [vmem:[#allocation5 + $0x8] sm:$0xff]  ;;  %v64_v4 = vld [vmem:[#allocation5 + $0x10] sm:$0xff]  ;;  %v65_v6 = vld [vmem:[#allocation5 + $0x18] sm:$0xff]  ;;  %vm73_vm1 = vcmask 261120   ;;  %s414_s7 = smov [#allocation8]  }
  0x38   :  { %295 = vmatprep.subr.bf16.mxu1 %v411_v0  ;;  %286 = vmatprep.mubr.msk.f32.mxu1 %vm412_vm0, %v413_v1  ;;  %v290_v5 = vpack.c.bf16 %v63_v3, %v62_v2  ;;  %v293_v7 = vpack.c.bf16 %v65_v6, %v64_v4  ;;  %v60_v8 = vld [vmem:[#allocation2] sm:$0xff]  ;;  %v152_v10 = vld [vmem:[#allocation7] sm:$0xff]  ;;  %v153_v11 = vld [vmem:[#allocation7 + $0x8] sm:$0xff]  ;;  %s243_s8 = sshll.u32 %s414_s7, 4  ;;  %s244_s8 = int_to_ptr.vmem [resolvable:$true] %s243_s8 }
  0x39   :  { %v61_v9 = vmax.f32 %v60_v8, 0.0  ;;  %v296_v12 = vpack.c.bf16 %v153_v11, %v152_v10  ;;  %v154_v13 = vld [vmem:[#allocation7 + $0x10] sm:$0xff]  ;;  %v155_v14 = vld [vmem:[#allocation7 + $0x18] sm:$0xff]  ;;  %p383_p11 = scmp.lt.s32.totalorder %s244_s8, %s244_s8 }
  0x3a   :  { %291 = vmatpush3.bf16.msra.mxu0 %v290_v5  ;;  %v299_v15 = vpack.c.bf16 %v155_v14, %v154_v13  ;;  %v253_v16 = vld [vmem:[%s509_s2] ss:$0 sm:$0xff]  ;;  %s378_s2 = scalar_lea.vmem %s244_s8, 128 }
  0x3b   :  { %292 = vmatprep.subr.bf16.mxu0 %v411_v0  ;;  %297 = vmatpush3.bf16.msra.mxu1 %v296_v12  ;;  %v255_v25 = vld [vmem:[%s511_s4] ss:$0 sm:$0xff]  ;;  %p379_p10 = scmp.ne.s32.totalorder %s244_s8, %s378_s2  ;;  %p384_p12 = scmp.lt.s32.totalorder %s378_s2, %s378_s2 }
  0x3c   :  { %298 = vmatprep.subr.bf16.mxu1 %v411_v0 }
  0x3d   :  { %p385_p13 = por %p384_p12, %p383_p11 }
  0x3e   :  { %294 = vmatpush3.bf16.msra.mxu0 %v293_v7 }
  0x3f   :  { %300 = vmatpush3.bf16.msra.mxu1 %v299_v15  ;;  %p386_p0 = pnand %p385_p13, %p379_p10 }
  0x41   :  { %276 = vmatmul.mubr.msk.f32.vlgmr.msra.gmra.mrb[0].mxu0 %vm73_vm1, %v61_v9 }
 0x114   :  { %v143_v17 = vpop.f32.mrb[0].mxu0 }
 0x115   :  { %v144_v18 = vadd.f32 %v253_v16, %v143_v17  ;;  %v277_v19 = vpop.f32.mrb[1].mxu0 }
 0x117   :  { %v148_v20 = vmul.f32 0.70710677, %v144_v18  ;;  %v147_v22 = vmul.f32 0.5, %v144_v18 }
 0x119   :  { %310 = verf.f32 %v148_v20 }
 0x123   :  { %v311_v21 = vpop.eup %310 }
 0x124   :  { %v150_v23 = vadd.f32 1.0, %v311_v21 }
 0x126   :  { %v151_v24 = vmul.f32 %v150_v23, %v147_v22 }
 0x128   :  { %287 = vmatmul.mubr.msk.f32.vlgmr.msra.gmra.mrb[0].mxu1 %vm73_vm1, %v151_v24 }
 0x1fb   :  { %v232_v26 = vpop.f32.mrb[0].mxu1 }
 0x1fc   :  { %v233_v27 = vadd.f32 %v255_v25, %v232_v26  ;;  %v288_v28 = vpop.f32.mrb[1].mxu1 }
 0x1fe   :  { %236 = vst [vmem:[#allocation8] sm:$0xff] %v233_v27 }
 0x1ff   :  { %389 = shalt.err (!%p386_p0)
}
 0x200   :  { %s390_s11 = scalar_lea.hbm %s512_s5, 128 }
 0x201   :  { %p391_p1 = scmp.ne.s32.totalorder %s512_s5, %s390_s11  ;;  %p394_p2 = scmp.lt.u32.totalorder %s390_s11, %s512_s5 }
 0x203   :  { %p396_p3 = pnand %p394_p2, %p391_p1 }
 0x205   :  { %399 = shalt.err (!%p396_p3)
}
 0x206   :  { %246 = dma.vmem_to_hbm [thread:$0]  %s244_s8, 128, %s512_s5, [#allocation4]  }
 0x207   :  { %404 = dma.done.wait [#allocation4], 128  }
 0x208   :  { %405 = vsyncadd [#allocation4], 4294967168 }
 0x209   :  { %250 = vsyncpa [#allocation3], 1 }
 0x20a   :  { %251 = vsyncpa [#allocation6], 1 }
 0x20b   :  { %252 = vsyncpa [#allocation4], 1 }

</bundles_post_ra>
